<compile_context>
chip_gen: v6e
topology: v6e:2x2x1
jax: 0.10.0
libtpu: 0.0.40
codegen_flags: <defaults>
</compile_context>

<pallas_src>
import functools
import math

import jax
import jax.numpy as jnp
from jax import lax
from jax.experimental import pallas as pl
from jax.experimental.pallas import tpu as pltpu


def _default_vmem_limit():
    """Generation-aware scoped-VMEM cap: ~56 MiB on v7x (64 MiB phys), 100 MiB on v5e/v6e."""
    cap = 64 * 1024 * 1024
    try:
        info = pltpu.get_tpu_info()
        cap = int(getattr(info, "vmem_capacity_bytes", cap))
    except Exception:
        pass
    return int(min(cap * 7 // 8, 100 * 1024 * 1024))


_VMEM_LIMIT = _default_vmem_limit()


def _pick_tile(dim, target, unit):
    """Largest tile <= target that is a multiple of `unit` and divides `dim` (else full dim)."""
    if dim <= target:
        return dim
    t = (target // unit) * unit
    while t >= unit:
        if dim % t == 0:
            return t
        t -= unit
    return dim


def _layer_norm(y_f32, gamma_f32, beta_f32, eps):
    mu = jnp.mean(y_f32, axis=-1, keepdims=True)
    yc = y_f32 - mu
    var = jnp.mean(yc * yc, axis=-1, keepdims=True)
    return yc * lax.rsqrt(var + eps) * gamma_f32 + beta_f32


# ---------------------------------------------------------------------------
# Kernel 1: tiled linear  y = x @ w_t + b  (w_t pre-transposed [in, out], bf16)
#           used for the fused QKV projection.  If K fits one tile the k grid axis
#           (and the accumulator) is dropped entirely.
# ---------------------------------------------------------------------------

def _linear_kernel_nok(x_ref, w_ref, b_ref, o_ref):
    y = jnp.dot(x_ref[...].astype(jnp.bfloat16), w_ref[...],
                preferred_element_type=jnp.float32)
    o_ref[...] = (y + b_ref[...].astype(jnp.float32)).astype(o_ref.dtype)


def _linear_kernel_ksplit(x_ref, w_ref, b_ref, o_ref, acc_ref, *, k_steps):
    @pl.when(pl.program_id(2) == 0)
    def _():
        acc_ref[...] = jnp.zeros_like(acc_ref)

    acc_ref[...] += jnp.dot(x_ref[...].astype(jnp.bfloat16), w_ref[...],
                            preferred_element_type=jnp.float32)

    @pl.when(pl.program_id(2) == k_steps - 1)
    def _():
        o_ref[...] = (acc_ref[...] + b_ref[...].astype(jnp.float32)).astype(o_ref.dtype)


def linear(x, w_t, b, *, out_dtype=None, tm=512, tn=512, tk=1024):
    """x[M, K] @ w_t[K, N] + b[N]   (w_t is the pre-transposed bf16 nn.Linear weight)."""
    m, kdim = x.shape
    n = w_t.shape[1]
    out_dtype = out_dtype if out_dtype is not None else x.dtype
    bm = _pick_tile(m, tm, 8)
    bn = _pick_tile(n, tn, 128)
    bk = _pick_tile(kdim, tk, 128)

    if bk == kdim:                      # whole-K tile: no accumulator / finalize step needed
        return pl.pallas_call(
            _linear_kernel_nok,
            out_shape=jax.ShapeDtypeStruct((m, n), out_dtype),
            grid=(m // bm, n // bn),
            in_specs=[pl.BlockSpec((bm, kdim), lambda i, j: (i, 0)),
                      pl.BlockSpec((kdim, bn), lambda i, j: (0, j)),
                      pl.BlockSpec((1, bn), lambda i, j: (0, j))],
            out_specs=pl.BlockSpec((bm, bn), lambda i, j: (i, j)),
            compiler_params=pltpu.CompilerParams(
                dimension_semantics=("parallel", "parallel"),
                vmem_limit_bytes=_VMEM_LIMIT),
        )(x, w_t, b.reshape(1, n))

    grid = (m // bm, n // bn, kdim // bk)
    return pl.pallas_call(
        functools.partial(_linear_kernel_ksplit, k_steps=grid[2]),
        out_shape=jax.ShapeDtypeStruct((m, n), out_dtype),
        grid=grid,
        in_specs=[pl.BlockSpec((bm, bk), lambda i, j, k: (i, k)),
                  pl.BlockSpec((bk, bn), lambda i, j, k: (k, j)),
                  pl.BlockSpec((1, bn), lambda i, j, k: (0, j))],
        out_specs=pl.BlockSpec((bm, bn), lambda i, j, k: (i, j)),
        scratch_shapes=[pltpu.VMEM((bm, bn), jnp.float32)],
        compiler_params=pltpu.CompilerParams(
            dimension_semantics=("parallel", "parallel", "arbitrary"),
            vmem_limit_bytes=_VMEM_LIMIT),
    )(x, w_t, b.reshape(1, n))


# ---------------------------------------------------------------------------
# Kernel 2: self-attention core + fused out-projection + bias + residual + LayerNorm.
#           Grid = (batch, query-tiles).  Per-head outputs go into a [tq, E] f32 VMEM scratch
#           (one lane-dense store at the end); the attention slab never round-trips HBM.
# ---------------------------------------------------------------------------

def _mha_outproj_ln_kernel(*refs, nhead, scale, has_mask, eps):
    if has_mask:
        q_ref, kv_ref, mask_ref, res_ref, wo_ref, bo_ref, g_ref, bt_ref, o_ref, acc_ref = refs
    else:
        q_ref, kv_ref, res_ref, wo_ref, bo_ref, g_ref, bt_ref, o_ref, acc_ref = refs
        mask_ref = None

    e = o_ref.shape[-1]
    d = e // nhead

    if has_mask:
        m = mask_ref[...].astype(jnp.float32)       # hoisted: cast once, not per head

    for h in range(nhead):                          # static unroll over heads
        q = q_ref[:, h * d:(h + 1) * d].astype(jnp.bfloat16)               # [tq, d]
        k = kv_ref[:, e + h * d:e + (h + 1) * d].astype(jnp.bfloat16)      # [T,  d]
        v = kv_ref[:, 2 * e + h * d:2 * e + (h + 1) * d].astype(jnp.bfloat16)
        # contract the shared head dim (both minor) -> scores [tq, T], f32 on the MXU
        s = lax.dot_general(q, k, (((1,), (1,)), ((), ())),
                            preferred_element_type=jnp.float32) * scale
        if has_mask:
            s = s + m
        s = s - jnp.max(s, axis=-1, keepdims=True)
        p = jnp.exp(s)
        p = p / jnp.sum(p, axis=-1, keepdims=True)
        acc_ref[:, h * d:(h + 1) * d] = jnp.dot(p.astype(jnp.bfloat16), v,
                                                preferred_element_type=jnp.float32)

    # fused out-projection epilogue: y = LN(attn @ Wo^T + bo + residual)
    y = jnp.dot(acc_ref[...].astype(jnp.bfloat16), wo_ref[...],
                preferred_element_type=jnp.float32)
    y = y + bo_ref[...].astype(jnp.float32) + res_ref[...].astype(jnp.float32)
    y = _layer_norm(y, g_ref[...].astype(jnp.float32), bt_ref[...].astype(jnp.float32), eps)
    o_ref[...] = y.astype(o_ref.dtype)


def mha_outproj_ln(qkv, x_flat, wo_t, bo, gamma, beta, nhead, attn_mask, *, eps=1e-5, tq=256):
    """qkv: [B, T, 3E] (bf16) fused projections.  Returns LN(x + attn_out @ Wo^T + bo): [B*T, E]."""
    b, t, e3 = qkv.shape
    e = e3 // 3
    d = e // nhead
    scale = 1.0 / math.sqrt(d)
    btq = _pick_tile(t, tq, 8)
    nq = t // btq
    has_mask = attn_mask is not None

    # TODO(synk): for very long T the full [T, 3E] K/V block should be KV-tiled with an online
    #             softmax (flash-style third grid axis) instead of held whole in VMEM.
    in_specs = [
        pl.BlockSpec((pl.Squeezed(), btq, e3), lambda i, j: (i, j, 0)),   # query-row tile
        pl.BlockSpec((pl.Squeezed(), t, e3), lambda i, j: (i, 0, 0)),     # full K/V (per batch)
    ]
    args = [qkv, qkv]
    if has_mask:
        in_specs.append(pl.BlockSpec((btq, t), lambda i, j: (j, 0)))
        args.append(attn_mask)
    in_specs += [
        pl.BlockSpec((btq, e), lambda i, j: (i * nq + j, 0)),             # residual rows
        pl.BlockSpec((e, e), lambda i, j: (0, 0)),                        # Wo^T (bf16)
        pl.BlockSpec((1, e), lambda i, j: (0, 0)),                        # bo
        pl.BlockSpec((1, e), lambda i, j: (0, 0)),                        # gamma
        pl.BlockSpec((1, e), lambda i, j: (0, 0)),                        # beta
    ]
    # TODO(synk): pipeline_mode=pl.Buffered(1) on the constant-index weight/bias specs would
    #             halve their VMEM footprint; left at the default for compile-safety.
    args += [x_flat, wo_t, bo.reshape(1, e), gamma.reshape(1, e), beta.reshape(1, e)]

    return pl.pallas_call(
        functools.partial(_mha_outproj_ln_kernel, nhead=nhead, scale=scale,
                          has_mask=has_mask, eps=eps),
        out_shape=jax.ShapeDtypeStruct((b * t, e), x_flat.dtype),
        grid=(b, nq),
        in_specs=in_specs,
        out_specs=pl.BlockSpec((btq, e), lambda i, j: (i * nq + j, 0)),
        scratch_shapes=[pltpu.VMEM((btq, e), jnp.float32)],
        compiler_params=pltpu.CompilerParams(
            dimension_semantics=("parallel", "parallel"),
            vmem_limit_bytes=_VMEM_LIMIT),
    )(*args)


# ---------------------------------------------------------------------------
# Kernel 3: fused FFN  y = LN(x + relu(x@W1^T + b1)@W2^T + b2), tiled over dim_ff.
#           Each grid step consumes one ff-chunk of W1/W2; the [bm, ff] intermediate exists
#           only one chunk at a time in VMEM and the output accumulates in f32 scratch.
# ---------------------------------------------------------------------------

def _ffn_res_ln_kernel(x_ref, w1_ref, b1_ref, w2_ref, b2_ref, g_ref, bt_ref, o_ref, acc_ref,
                       *, f_steps, eps):
    @pl.when(pl.program_id(1) == 0)
    def _():
        acc_ref[...] = jnp.zeros_like(acc_ref)

    x_bf = x_ref[...].astype(jnp.bfloat16)
    h = jnp.dot(x_bf, w1_ref[...], preferred_element_type=jnp.float32)      # [bm, bf]
    h = jnp.maximum(h + b1_ref[...].astype(jnp.float32), 0.0)
    acc_ref[...] += jnp.dot(h.astype(jnp.bfloat16), w2_ref[...],
                            preferred_element_type=jnp.float32)             # [bm, e]

    @pl.when(pl.program_id(1) == f_steps - 1)
    def _():
        y = acc_ref[...] + b2_ref[...].astype(jnp.float32) + x_ref[...].astype(jnp.float32)
        y = _layer_norm(y, g_ref[...].astype(jnp.float32), bt_ref[...].astype(jnp.float32), eps)
        o_ref[...] = y.astype(o_ref.dtype)


def ffn_residual_layernorm(x, w1_t, b1, w2_t, b2, gamma, beta, *, eps=1e-5, tm=256, tf=1024):
    m, e = x.shape
    ff = w1_t.shape[1]
    bm = _pick_tile(m, tm, 8)
    bf = _pick_tile(ff, tf, 128)
    grid = (m // bm, ff // bf)
    return pl.pallas_call(
        functools.partial(_ffn_res_ln_kernel, f_steps=grid[1], eps=eps),
        out_shape=jax.ShapeDtypeStruct((m, e), x.dtype),
        grid=grid,
        in_specs=[
            pl.BlockSpec((bm, e), lambda i, f: (i, 0)),     # x rows (constant over ff axis)
            pl.BlockSpec((e, bf), lambda i, f: (0, f)),     # W1^T chunk  [E, bf]
            pl.BlockSpec((1, bf), lambda i, f: (0, f)),     # b1 chunk
            pl.BlockSpec((bf, e), lambda i, f: (f, 0)),     # W2^T chunk  [bf, E]
            pl.BlockSpec((1, e), lambda i, f: (0, 0)),      # b2
            pl.BlockSpec((1, e), lambda i, f: (0, 0)),      # gamma
            pl.BlockSpec((1, e), lambda i, f: (0, 0)),      # beta
        ],
        out_specs=pl.BlockSpec((bm, e), lambda i, f: (i, 0)),
        scratch_shapes=[pltpu.VMEM((bm, e), jnp.float32)],
        compiler_params=pltpu.CompilerParams(
            dimension_semantics=("parallel", "arbitrary"),
            vmem_limit_bytes=_VMEM_LIMIT),
    )(x, w1_t, b1.reshape(1, ff), w2_t, b2.reshape(1, e),
      gamma.reshape(1, e), beta.reshape(1, e))


# ---------------------------------------------------------------------------
# Kernel 4: plain LayerNorm (optional final norm of the encoder stack)
# ---------------------------------------------------------------------------

def _ln_kernel(x_ref, g_ref, b_ref, o_ref, *, eps):
    y = _layer_norm(x_ref[...].astype(jnp.float32),
                    g_ref[...].astype(jnp.float32), b_ref[...].astype(jnp.float32), eps)
    o_ref[...] = y.astype(o_ref.dtype)


def layernorm(x, gamma, beta, *, eps=1e-5, tm=512):
    m, e = x.shape
    bm = _pick_tile(m, tm, 8)
    return pl.pallas_call(
        functools.partial(_ln_kernel, eps=eps),
        out_shape=jax.ShapeDtypeStruct((m, e), x.dtype),
        grid=(m // bm,),
        in_specs=[pl.BlockSpec((bm, e), lambda i: (i, 0)),
                  pl.BlockSpec((1, e), lambda i: (0, 0)),
                  pl.BlockSpec((1, e), lambda i: (0, 0))],
        out_specs=pl.BlockSpec((bm, e), lambda i: (i, 0)),
        compiler_params=pltpu.CompilerParams(
            dimension_semantics=("parallel",),
            vmem_limit_bytes=_VMEM_LIMIT),
    )(x, gamma.reshape(1, e), beta.reshape(1, e))


# ---------------------------------------------------------------------------
# Module forward (glue in plain JAX, hot path in the kernels above)
# ---------------------------------------------------------------------------

def _prep_layer(p):
    """One-time (outside the kernels) bf16 cast + [out,in] -> [in,out] transpose of the weights."""
    bf = jnp.bfloat16
    return {
        "wqkv": p["in_proj_weight"].astype(bf).T,      # [E, 3E]
        "bqkv": p["in_proj_bias"],
        "wo": p["out_proj_weight"].astype(bf).T,       # [E, E]
        "bo": p["out_proj_bias"],
        "w1": p["linear1_w"].astype(bf).T,             # [E, ff]
        "b1": p["linear1_b"],
        "w2": p["linear2_w"].astype(bf).T,             # [ff, E]
        "b2": p["linear2_b"],
        "g1": p["norm1_w"], "be1": p["norm1_b"],
        "g2": p["norm2_w"], "be2": p["norm2_b"],
    }


def encoder_layer_fwd(x_flat, w, nhead, b, t, attn_mask):
    e = x_flat.shape[-1]
    # fused QKV projection: ONE matmul against [E, 3E]; output kept bf16 (attention-only consumer)
    qkv = linear(x_flat, w["wqkv"], w["bqkv"], out_dtype=jnp.bfloat16)       # [B*T, 3E]
    # attention + out-projection + bias + residual + LayerNorm, all in one kernel
    x1 = mha_outproj_ln(qkv.reshape(b, t, 3 * e), x_flat,
                        w["wo"], w["bo"], w["g1"], w["be1"], nhead, attn_mask)
    # fused FFN (relu) + residual + LayerNorm, ff-tiled
    return ffn_residual_layernorm(x1, w["w1"], w["b1"], w["w2"], w["b2"], w["g2"], w["be2"])


def transformer_encoder_fwd(src, layer_params, final_norm, nhead,
                            mask=None, src_key_padding_mask=None):
    # TODO(synk): src_key_padding_mask / bool masks / dropout are not implemented
    #             (reference call sites pass None; eval-mode parity only).
    t, b, e = src.shape
    attn_mask = None if mask is None else mask.astype(jnp.float32)
    # one layout change for the whole stack: [T, B, E] -> batch-major [B*T, E]
    x = jnp.transpose(src, (1, 0, 2)).reshape(b * t, e)
    for p in layer_params:
        w = _prep_layer(p)
        x = encoder_layer_fwd(x, w, nhead, b, t, attn_mask)
    if final_norm is not None:
        x = layernorm(x, final_norm[0], final_norm[1])
    return jnp.transpose(x.reshape(b, t, e), (1, 0, 2))


# ---------------------------------------------------------------------------
# Deterministic parameter initialization (PyTorch layout, f32 master copies)
# ---------------------------------------------------------------------------

def init_params(key, num_layers, e, dim_ff):
    keys = jax.random.split(key, num_layers)
    layers = []
    for i in range(num_layers):
        ks = jax.random.split(keys[i], 4)
        layers.append({
            "in_proj_weight": jax.random.normal(ks[0], (3 * e, e), jnp.float32) / math.sqrt(e),
            "in_proj_bias": jnp.zeros((3 * e,), jnp.float32),
            "out_proj_weight": jax.random.normal(ks[1], (e, e), jnp.float32) / math.sqrt(e),
            "out_proj_bias": jnp.zeros((e,), jnp.float32),
            "linear1_w": jax.random.normal(ks[2], (dim_ff, e), jnp.float32) / math.sqrt(e),
            "linear1_b": jnp.zeros((dim_ff,), jnp.float32),
            "linear2_w": jax.random.normal(ks[3], (e, dim_ff), jnp.float32) / math.sqrt(dim_ff),
            "linear2_b": jnp.zeros((e,), jnp.float32),
            "norm1_w": jnp.ones((e,), jnp.float32), "norm1_b": jnp.zeros((e,), jnp.float32),
            "norm2_w": jnp.ones((e,), jnp.float32), "norm2_b": jnp.zeros((e,), jnp.float32),
        })
    final_norm = (jnp.ones((e,), jnp.float32), jnp.zeros((e,), jnp.float32))
    return layers, final_norm


if __name__ == "__main__":
    T, B, E = 8, 2, 32            # seq len, batch, d_model
    NHEAD, DIM_FF, NUM_LAYERS = 4, 64, 2

    root = jax.random.PRNGKey(0)
    k_src, k_par = jax.random.split(root)
    src = jax.random.normal(k_src, (T, B, E), jnp.float32)
    layer_params, final_norm = init_params(k_par, NUM_LAYERS, E, DIM_FF)

    # mask=None path (static skip of the mask operand)
    out = transformer_encoder_fwd(src, layer_params, final_norm, NHEAD, mask=None)
    out = jax.block_until_ready(out)
    assert out.shape == (T, B, E) and bool(jnp.all(jnp.isfinite(out)))

    # additive src_mask path (same convention as nn.Transformer float masks)
    causal = jnp.where(jnp.tril(jnp.ones((T, T), bool)), 0.0, -1e9).astype(jnp.float32)
    out_m = transformer_encoder_fwd(src, layer_params, final_norm, NHEAD, mask=causal)
    out_m = jax.block_until_ready(out_m)
    assert out_m.shape == (T, B, E) and bool(jnp.all(jnp.isfinite(out_m)))

    print("KERNEL_OK")
</pallas_src>

<mosaic_0001>
module attributes {stable_mosaic.version = 11 : i64} {
  func.func @_linear_kernel_nok(%arg0: i32, %arg1: i32, %arg2: memref<16x32xf32, #tpu.memory_space<vmem>>, %arg3: memref<32x96xbf16, #tpu.memory_space<vmem>>, %arg4: memref<1x96xf32, #tpu.memory_space<vmem>>, %arg5: memref<16x96xbf16, #tpu.memory_space<vmem>>) attributes {dimension_semantics = [#tpu.dimension_semantics<parallel>, #tpu.dimension_semantics<parallel>], iteration_bounds = array<i64: 1, 1>, scalar_prefetch = 0 : i64, scratch_operands = 0 : i64, tpu.core_type = #tpu.core_type<tc>, window_params = [{transform_indices = @transform_0, window_bounds = array<i64: 16, 32>}, {transform_indices = @transform_1, window_bounds = array<i64: 32, 96>}, {transform_indices = @transform_2, window_bounds = array<i64: 1, 96>}, {transform_indices = @transform_3, window_bounds = array<i64: 16, 96>}]} {
    %c0 = arith.constant 0 : index
    %c0_0 = arith.constant 0 : index
    %0 = vector.load %arg2[%c0, %c0_0] : memref<16x32xf32, #tpu.memory_space<vmem>>, vector<16x32xf32>
    %1 = arith.truncf %0 : vector<16x32xf32> to vector<16x32xbf16>
    %c0_1 = arith.constant 0 : index
    %c0_2 = arith.constant 0 : index
    %2 = vector.load %arg3[%c0_1, %c0_2] : memref<32x96xbf16, #tpu.memory_space<vmem>>, vector<32x96xbf16>
    %cst = arith.constant dense<0.000000e+00> : vector<16x96xf32>
    %3 = tpu.matmul %1, %2, %cst {dimension_numbers = #tpu.dot_dimension_numbers<[1], [0], [0], [1], [0, 0, 1, 1], [], []>} : vector<16x32xbf16>, vector<32x96xbf16>, vector<16x96xf32> -> vector<16x96xf32>
    %c0_3 = arith.constant 0 : index
    %c0_4 = arith.constant 0 : index
    %4 = vector.load %arg4[%c0_3, %c0_4] : memref<1x96xf32, #tpu.memory_space<vmem>>, vector<1x96xf32>
    %5 = vector.broadcast %4 : vector<1x96xf32> to vector<16x96xf32>
    %6 = arith.addf %3, %5 : vector<16x96xf32>
    %7 = arith.truncf %6 : vector<16x96xf32> to vector<16x96xbf16>
    %c0_5 = arith.constant 0 : index
    %c0_6 = arith.constant 0 : index
    %8 = vector.load %arg5[%c0_5, %c0_6] : memref<16x96xbf16, #tpu.memory_space<vmem>>, vector<16x96xbf16>
    tpu.vector_store %arg5[%c0_5, %c0_6], %7 {strides = array<i32>} : memref<16x96xbf16, #tpu.memory_space<vmem>>, vector<16x96xbf16>,
    return
  }
  func.func @transform_0(%arg0: i32, %arg1: i32) -> (i32, i32) {
    %c0_i32 = arith.constant 0 : i32
    %c0_i32_0 = arith.constant 0 : i32
    return %arg0, %c0_i32 : i32, i32
  }
  func.func @transform_1(%arg0: i32, %arg1: i32) -> (i32, i32) {
    %c0_i32 = arith.constant 0 : i32
    %c0_i32_0 = arith.constant 0 : i32
    return %c0_i32, %arg1 : i32, i32
  }
  func.func @transform_2(%arg0: i32, %arg1: i32) -> (i32, i32) {
    %c0_i32 = arith.constant 0 : i32
    %c0_i32_0 = arith.constant 0 : i32
    return %c0_i32, %arg1 : i32, i32
  }
  func.func @transform_3(%arg0: i32, %arg1: i32) -> (i32, i32) {
    %c0_i32 = arith.constant 0 : i32
    return %arg0, %arg1 : i32, i32
  }
}

</mosaic_0001>

<bundles_post_ra>
// kernel: tpu_custom_call.1
= control target key start
LH: loop header
LB: loop body
LE: loop exit
PB: predicated region body
PF: predicated region fallthrough
CT: control target
= control target key end

     0   :  { %8 = vsyncpa [#allocation3], 0  ;;  %s287_s0 = inlined_call_operand.hbm [shape: f32[16,32], index: 0, kind: input, shape index: {}]   ;;  %s288_s1 = inlined_call_operand.hbm [shape: bf16[32,96], index: 1, kind: input, shape index: {}]   ;;  %s289_s2 = inlined_call_operand.vmem [shape: f32[1,96], index: 2, kind: input, shape index: {}]   ;;  %s290_s3 = inlined_call_operand.hbm [shape: bf16[16,96], index: 3, kind: output, shape index: {}]  }
   0x1   :  { %9 = vsyncpa [#allocation6], 0 }
   0x2   :  { %10 = vsyncpa [#allocation4], 0  ;;  %s240_s12 = smov [#allocation2]  }
   0x3   :  { %s16_s13 = sshll.u32 %s240_s12, 4  ;;  %s17_s13 = int_to_ptr.vmem [resolvable:$true] %s16_s13 }
   0x4   :  { %s182_s14 = scalar_lea.vmem %s17_s13, 256  ;;  %p187_p1 = scmp.lt.s32.totalorder %s17_s13, %s17_s13 }
   0x5   :  { %p183_p0 = scmp.ne.s32.totalorder %s17_s13, %s182_s14  ;;  %p188_p2 = scmp.lt.s32.totalorder %s182_s14, %s182_s14 }
   0x7   :  { %p189_p3 = por %p188_p2, %p187_p1 }
   0x9   :  { %p190_p4 = pnand %p189_p3, %p183_p0 }
   0xb   :  { %193 = shalt.err (!%p190_p4)
}
   0xc   :  { %s241_s15 = smov 128   ;;  %s242_s16 = smov 8  }
   0xd   :  { %22 = dma.hbm_to_vmem [thread:$0]  %s287_s0, 256, %s17_s13, [#allocation3], %s241_s15, %s241_s15, %s242_s16  }
   0xe   :  { %s243_s19 = smov [#allocation5]  }
   0xf   :  { %s28_s20 = sshll.u32 %s243_s19, 4  ;;  %s29_s20 = int_to_ptr.vmem [resolvable:$true] %s28_s20 }
  0x10   :  { %s202_s21 = scalar_lea.vmem %s29_s20, 256  ;;  %p207_p6 = scmp.lt.s32.totalorder %s29_s20, %s29_s20 }
  0x11   :  { %p203_p5 = scmp.ne.s32.totalorder %s29_s20, %s202_s21  ;;  %p208_p7 = scmp.lt.s32.totalorder %s202_s21, %s202_s21 }
  0x13   :  { %p209_p8 = por %p208_p7, %p207_p6 }
  0x15   :  { %p210_p9 = pnand %p209_p8, %p203_p5 }
  0x17   :  { %213 = shalt.err (!%p210_p9)
}
  0x18   :  { %s244_s22 = smov 64   ;;  %s245_s23 = smov 4  }
  0x19   :  { %34 = dma.hbm_to_vmem [thread:$0]  %s288_s1, 256, %s29_s20, [#allocation6], %s244_s22, %s244_s22, %s245_s23  }
  0x1a   :  { %234 = dma.done.wait [#allocation3], 256  }
  0x1b   :  { %235 = vsyncadd [#allocation3], 4294967040 }
  0x1c   :  { %236 = dma.done.wait [#allocation6], 256  }
  0x1d   :  { %237 = vsyncadd [#allocation6], 4294967040  ;;  %v246_v0 = vmov 0.0   ;;  %vm247_vm0 = vmmov 0   ;;  %v172_v1 = vld [vmem:[#allocation5 + $0x8] sm:$0xff]   ;;  %v173_v2 = vld [vmem:[#allocation5] sm:$0xff]  }
  0x1e   :  { %155 = vmatprep.subr.bf16.mxu0 %v246_v0  ;;  %159 = vmatprep.mubr.msk.bf16.mxu0 %vm247_vm0, %v246_v0  ;;  %v44_v3 = vld [vmem:[#allocation2] sm:$0xff]  ;;  %v45_v4 = vld [vmem:[#allocation2 + $0x8] sm:$0xff]  ;;  %vm70_vm1 = vcmask 261120   ;;  %vm123_vm2 = vcmask 781312   ;;  %s248_s26 = smov [#allocation7]  }
  0x1f   :  { %156 = vmatpush3.bf16.msra.mxu0 %v172_v1  ;;  %v46_v5 = vpack.c.bf16 %v45_v4, %v44_v3  ;;  %v144_v6 = vld [vmem:[%s289_s2] ss:$0 sm:$0xff]  ;;  %s131_s27 = sshll.u32 %s248_s26, 4  ;;  %s132_s27 = int_to_ptr.vmem [resolvable:$true] %s131_s27 }
  0x20   :  { %157 = vmatprep.subr.bf16.mxu0 %v246_v0  ;;  %s214_s28 = scalar_lea.vmem %s132_s27, 128  ;;  %p219_p11 = scmp.lt.s32.totalorder %s132_s27, %s132_s27 }
  0x21   :  { %p215_p10 = scmp.ne.s32.totalorder %s132_s27, %s214_s28  ;;  %p220_p12 = scmp.lt.s32.totalorder %s214_s28, %s214_s28 }
  0x23   :  { %158 = vmatpush3.bf16.msra.mxu0 %v173_v2  ;;  %p221_p13 = por %p220_p12, %p219_p11 }
  0x25   :  { %p222_p0 = pnand %p221_p13, %p215_p10 }
  0x26   :  { %160 = vmatmul.mubr.msk.bf16.vlgmr.msra.gmra.mxu0 %vm70_vm1, %v46_v5 }
  0xe6   :  { %v108_v7 = vpop.f32.mrf.mxu0 }
  0xe7   :  { %v109_v8 = vadd.f32 %v144_v6, %v108_v7 }
  0xe8   :  { %v161_v9 = vpop.f32.mrf.mxu0 }
  0xe9   :  { %v150_v10 = vpack.c.bf16 %v109_v8, %v109_v8 }
  0xea   :  { %v111_v11 = vpop.f32.mrf.mxu0 }
  0xeb   :  { %v112_v12 = vadd.f32 %v144_v6, %v111_v11  ;;  %124 = vst.msk [vmem:[#allocation7] sm:$0xf] %vm123_vm2, %v150_v10 }
  0xec   :  { %v162_v13 = vpop.f32.mrf.mxu0 }
  0xed   :  { %v151_v14 = vpack.c.bf16 %v112_v12, %v112_v12 }
  0xef   :  { %125 = vst.msk [vmem:[#allocation7 + $0x4] sm:$0xf] %vm123_vm2, %v151_v14 }
  0xf0   :  { %225 = shalt.err (!%p222_p0)
}
  0xf1   :  { %137 = dma.vmem_to_hbm [thread:$0]  %s132_s27, 128, %s290_s3, [#allocation4], %s244_s22, %s244_s22, %s245_s23  }
  0xf2   :  { %238 = dma.done.wait [#allocation4], 128  }
  0xf3   :  { %239 = vsyncadd [#allocation4], 4294967168 }
  0xf4   :  { %141 = vsyncpa [#allocation3], 1 }
  0xf5   :  { %142 = vsyncpa [#allocation6], 1 }
  0xf6   :  { %143 = vsyncpa [#allocation4], 1 }

</bundles_post_ra>
